<compile_context>
chip_gen: v5e
topology: v5e:2x2
jax: 0.10.0
libtpu: 0.0.40
codegen_flags: <defaults>
</compile_context>

<pallas_src>
import functools

import jax
import jax.numpy as jnp
from jax.experimental import pallas as pl
from jax.experimental.pallas import tpu as pltpu


def _up_concat_kernel(r_ref, x_ref, wt_ref, b_ref, dw_ref, o_ref, *,
                      W, th, C, use_vpu_conv):
    """Per (batch, row-tile) block.

    r_ref : (1, Cout, 4*S)   residual channels (already 2H x 2W, flattened), S = th*W
    x_ref : (1, C,    S)     low-res input rows, flattened spatial tile
    wt_ref: (Cout, C)        1x1 conv weight, transposed for (Cout,C)@(C,S)
    b_ref : (Cout, 1)        bias (broadcasts along lanes)
    dw_ref: (S, 2*S)         0/1 W-duplication operator (one nonzero per column)
    o_ref : (1, 2*Cout, 4*S) fused [r ; conv(upsample(x))] output block
    """
    cout = r_ref.shape[1]

    # Fused torch.cat: residual channels pass straight through to the output.
    o_ref[0, :cout, :] = r_ref[0].astype(o_ref.dtype)

    # ---- 1x1 conv on the LOW-RES tile (conv commutes with nearest upsample) ----
    x = x_ref[0].astype(jnp.float32)            # (C, S)
    wt = wt_ref[...].astype(jnp.float32)        # (Cout, C)
    if use_vpu_conv:
        # Tiny channel counts: C broadcast FMAs on the VPU; an MXU matmul at
        # these shapes would be <2% utilized and push/pop-latency bound.
        y = wt[:, 0:1] * x[0:1, :]
        for c in range(1, C):
            y = y + wt[:, c:c + 1] * x[c:c + 1, :]
    else:
        y = jnp.dot(wt, x, preferred_element_type=jnp.float32)
    y = y + b_ref[...].astype(jnp.float32)      # (Cout, S)

    # ---- nearest 2x along W: (Cout, S) @ (S, 2S) exact 0/1 duplication ----------
    # yw[o, 2*W*h + 2*w + dw] = y[o, W*h + w]
    yw = jnp.dot(y, dw_ref[...], preferred_element_type=jnp.float32)   # (Cout, 2S)

    # ---- nearest 2x along H: write each 2W-wide row chunk twice -----------------
    # Assemble the full (Cout, 4S) slab so the store is a single lane-dense store;
    # lane order becomes 4W*h + 2W*dh + (2w + dw) = flattened (2h+dh, 2w+dw).
    pieces = []
    for h in range(th):
        row = yw[:, 2 * W * h: 2 * W * (h + 1)]        # (Cout, 2W) static slice
        pieces.append(row)
        pieces.append(row)
    up = jnp.concatenate(pieces, axis=-1)              # (Cout, 4*S)
    o_ref[0, cout:, :] = up.astype(o_ref.dtype)


def _pick_row_tile(H, W, max_out_lanes=4096):
    """Row tile th (divisor of H): output block lane width 4*th*W stays <= ~4096
    and is a multiple of 128 whenever th < H (lane-dense, unmasked stores)."""
    if 4 * H * W <= max_out_lanes:
        return H                                       # whole image per step
    for th in range(H, 0, -1):                         # largest lane-aligned divisor
        if H % th == 0 and 4 * th * W <= max_out_lanes and (th * W) % 128 == 0:
            return th
    # TODO(synk): also tile W for very wide images; whole-image fallback keeps the
    # block shape legal (full array dims) at the cost of a large VMEM block.
    return H


def up_sample_pallas(x_nchw, r_nchw, w, b):
    """x: (N, C, H, W), r: (N, C//2, 2H, 2W), w: (C, C//2), b: (1, C//2)."""
    N, C, H, W = x_nchw.shape
    Cout = w.shape[1]
    assert r_nchw.shape == (N, Cout, 2 * H, 2 * W)
    out_dtype = jnp.promote_types(x_nchw.dtype, r_nchw.dtype)

    th = _pick_row_tile(H, W)
    if N == 1 and th == H and H > 1:
        # Keep >=2 grid steps so both TensorCores of a 2-core chip get work.
        for cand in range(H // 2, 0, -1):
            if H % cand == 0 and (cand * W) % 128 == 0:
                th = cand
                break
    S = th * W

    # Metadata-only reshapes (layout stays NCHW row-major).
    x3 = x_nchw.reshape(N, C, H * W)
    r3 = r_nchw.reshape(N, Cout, 4 * H * W)
    wT = w.T                                           # (Cout, C)
    b2 = b.reshape(Cout, 1)                            # (Cout, 1)

    # W-duplication operator: D[W*h + w, 2*W*h + 2*w + dw] = 1 for dw in {0,1}.
    dw_op = (jnp.arange(2 * S)[None, :] // 2 ==
             jnp.arange(S)[:, None]).astype(jnp.float32)          # (S, 2S)

    use_vpu_conv = (C <= 8 and Cout <= 8)
    kernel = functools.partial(_up_concat_kernel, W=W, th=th, C=C,
                               use_vpu_conv=use_vpu_conv)

    grid = (N, H // th)

    out3 = pl.pallas_call(
        kernel,
        out_shape=jax.ShapeDtypeStruct((N, 2 * Cout, 4 * H * W), out_dtype),
        grid=grid,
        in_specs=[
            pl.BlockSpec((1, Cout, 4 * S), lambda n, j: (n, 0, j)),      # r
            pl.BlockSpec((1, C, S), lambda n, j: (n, 0, j)),             # x
            pl.BlockSpec((Cout, C), lambda n, j: (0, 0),                 # weight
                         pipeline_mode=pl.Buffered(1)),
            pl.BlockSpec((Cout, 1), lambda n, j: (0, 0),                 # bias
                         pipeline_mode=pl.Buffered(1)),
            pl.BlockSpec((S, 2 * S), lambda n, j: (0, 0),                # W-dup op
                         pipeline_mode=pl.Buffered(1)),
        ],
        out_specs=pl.BlockSpec((1, 2 * Cout, 4 * S), lambda n, j: (n, 0, j)),
        compiler_params=pltpu.CompilerParams(
            dimension_semantics=("parallel", "parallel")),
    )(r3, x3, wT, b2, dw_op)

    # Free reshape back to NCHW 4-D.
    return out3.reshape(N, 2 * Cout, 2 * H, 2 * W)


def _reference(x_nchw, r_nchw, w, b):
    """Plain-JAX reference mirroring the PyTorch forward."""
    up = jnp.repeat(jnp.repeat(x_nchw, 2, axis=2), 2, axis=3)               # nearest 2x
    up = jnp.einsum("nchw,co->nohw", up, w) + b[0][None, :, None, None]     # 1x1 conv
    return jnp.concatenate([r_nchw, up], axis=1)


if __name__ == "__main__":
    key = jax.random.PRNGKey(0)
    k_x, k_r, k_w, k_b = jax.random.split(key, 4)

    N, C, H, W = 2, 4, 16, 16
    Cout = C // 2

    x = jax.random.normal(k_x, (N, C, H, W), dtype=jnp.float32)
    r = jax.random.normal(k_r, (N, Cout, 2 * H, 2 * W), dtype=jnp.float32)
    # Conv2d(C, C//2, 1) params: weight passed as (C, Cout) (PyTorch checkpoints
    # store (Cout, C, 1, 1); callers must transpose), bias as (1, Cout).
    w = jax.random.normal(k_w, (C, Cout), dtype=jnp.float32) * 0.1
    b = jax.random.normal(k_b, (1, Cout), dtype=jnp.float32) * 0.1

    out = jax.jit(up_sample_pallas)(x, r, w, b)
    out = jax.block_until_ready(out)

    ref = _reference(x, r, w, b)
    assert out.shape == (N, 2 * Cout, 2 * H, 2 * W), out.shape
    assert jnp.allclose(out, ref, atol=1e-5, rtol=1e-5), "mismatch vs reference"

    print("KERNEL_OK")
</pallas_src>

<mosaic_0001>
module attributes {stable_mosaic.version = 11 : i64} {
  func.func @_up_concat_kernel(%arg0: i32, %arg1: i32, %arg2: memref<1x2x1024xf32, #tpu.memory_space<vmem>>, %arg3: memref<1x4x256xf32, #tpu.memory_space<vmem>>, %arg4: memref<2x4xf32, #tpu.memory_space<vmem>>, %arg5: memref<2x1xf32, #tpu.memory_space<vmem>>, %arg6: memref<256x512xf32, #tpu.memory_space<vmem>>, %arg7: memref<1x4x1024xf32, #tpu.memory_space<vmem>>) attributes {dimension_semantics = [#tpu.dimension_semantics<parallel>, #tpu.dimension_semantics<parallel>], iteration_bounds = array<i64: 2, 1>, scalar_prefetch = 0 : i64, scratch_operands = 0 : i64, tpu.core_type = #tpu.core_type<tc>, window_params = [{transform_indices = @transform_0, window_bounds = array<i64: 1, 2, 1024>}, {transform_indices = @transform_1, window_bounds = array<i64: 1, 4, 256>}, {pipeline_mode = #tpu.pipeline_mode<synchronous>, transform_indices = @transform_2, window_bounds = array<i64: 2, 4>}, {pipeline_mode = #tpu.pipeline_mode<synchronous>, transform_indices = @transform_3, window_bounds = array<i64: 2, 1>}, {pipeline_mode = #tpu.pipeline_mode<synchronous>, transform_indices = @transform_4, window_bounds = array<i64: 256, 512>}, {transform_indices = @transform_5, window_bounds = array<i64: 1, 4, 1024>}]} {
    %c0 = arith.constant 0 : index
    %c0_0 = arith.constant 0 : index
    %c0_1 = arith.constant 0 : index
    %0 = vector.load %arg2[%c0, %c0_0, %c0_1] : memref<1x2x1024xf32, #tpu.memory_space<vmem>>, vector<1x2x1024xf32>
    %1 = vector.shape_cast %0 : vector<1x2x1024xf32> to vector<2x1024xf32>
    %c0_2 = arith.constant 0 : index
    %c0_3 = arith.constant 0 : index
    %c0_4 = arith.constant 0 : index
    %2 = vector.load %arg7[%c0_2, %c0_3, %c0_4] : memref<1x4x1024xf32, #tpu.memory_space<vmem>>, vector<1x2x1024xf32>
    %3 = vector.shape_cast %2 : vector<1x2x1024xf32> to vector<2x1024xf32>
    %4 = vector.shape_cast %1 : vector<2x1024xf32> to vector<1x2x1024xf32>
    tpu.vector_store %arg7[%c0_2, %c0_3, %c0_4], %4 {strides = array<i32>} : memref<1x4x1024xf32, #tpu.memory_space<vmem>>, vector<1x2x1024xf32>,
    %c0_5 = arith.constant 0 : index
    %c0_6 = arith.constant 0 : index
    %c0_7 = arith.constant 0 : index
    %5 = vector.load %arg3[%c0_5, %c0_6, %c0_7] : memref<1x4x256xf32, #tpu.memory_space<vmem>>, vector<1x4x256xf32>
    %6 = vector.shape_cast %5 : vector<1x4x256xf32> to vector<4x256xf32>
    %c0_8 = arith.constant 0 : index
    %c0_9 = arith.constant 0 : index
    %7 = vector.load %arg4[%c0_8, %c0_9] : memref<2x4xf32, #tpu.memory_space<vmem>>, vector<2x4xf32>
    %8 = vector.extract_strided_slice %7 {offsets = [0, 0], sizes = [2, 1], strides = [1, 1]} : vector<2x4xf32> to vector<2x1xf32>
    %9 = vector.extract_strided_slice %6 {offsets = [0, 0], sizes = [1, 256], strides = [1, 1]} : vector<4x256xf32> to vector<1x256xf32>
    %10 = vector.broadcast %8 : vector<2x1xf32> to vector<2x256xf32>
    %11 = vector.broadcast %9 : vector<1x256xf32> to vector<2x256xf32>
    %12 = arith.mulf %10, %11 : vector<2x256xf32>
    %13 = vector.extract_strided_slice %7 {offsets = [0, 1], sizes = [2, 1], strides = [1, 1]} : vector<2x4xf32> to vector<2x1xf32>
    %14 = vector.extract_strided_slice %6 {offsets = [1, 0], sizes = [1, 256], strides = [1, 1]} : vector<4x256xf32> to vector<1x256xf32>
    %15 = vector.broadcast %13 : vector<2x1xf32> to vector<2x256xf32>
    %16 = vector.broadcast %14 : vector<1x256xf32> to vector<2x256xf32>
    %17 = arith.mulf %15, %16 : vector<2x256xf32>
    %18 = arith.addf %12, %17 : vector<2x256xf32>
    %19 = vector.extract_strided_slice %7 {offsets = [0, 2], sizes = [2, 1], strides = [1, 1]} : vector<2x4xf32> to vector<2x1xf32>
    %20 = vector.extract_strided_slice %6 {offsets = [2, 0], sizes = [1, 256], strides = [1, 1]} : vector<4x256xf32> to vector<1x256xf32>
    %21 = vector.broadcast %19 : vector<2x1xf32> to vector<2x256xf32>
    %22 = vector.broadcast %20 : vector<1x256xf32> to vector<2x256xf32>
    %23 = arith.mulf %21, %22 : vector<2x256xf32>
    %24 = arith.addf %18, %23 : vector<2x256xf32>
    %25 = vector.extract_strided_slice %7 {offsets = [0, 3], sizes = [2, 1], strides = [1, 1]} : vector<2x4xf32> to vector<2x1xf32>
    %26 = vector.extract_strided_slice %6 {offsets = [3, 0], sizes = [1, 256], strides = [1, 1]} : vector<4x256xf32> to vector<1x256xf32>
    %27 = vector.broadcast %25 : vector<2x1xf32> to vector<2x256xf32>
    %28 = vector.broadcast %26 : vector<1x256xf32> to vector<2x256xf32>
    %29 = arith.mulf %27, %28 : vector<2x256xf32>
    %30 = arith.addf %24, %29 : vector<2x256xf32>
    %c0_10 = arith.constant 0 : index
    %c0_11 = arith.constant 0 : index
    %31 = vector.load %arg5[%c0_10, %c0_11] : memref<2x1xf32, #tpu.memory_space<vmem>>, vector<2x1xf32>
    %32 = vector.broadcast %31 : vector<2x1xf32> to vector<2x256xf32>
    %33 = arith.addf %30, %32 : vector<2x256xf32>
    %c0_12 = arith.constant 0 : index
    %c0_13 = arith.constant 0 : index
    %34 = vector.load %arg6[%c0_12, %c0_13] : memref<256x512xf32, #tpu.memory_space<vmem>>, vector<256x512xf32>
    %cst = arith.constant dense<0.000000e+00> : vector<2x512xf32>
    %35 = tpu.matmul %33, %34, %cst {dimension_numbers = #tpu.dot_dimension_numbers<[1], [0], [0], [1], [0, 0, 1, 1], [], []>} : vector<2x256xf32>, vector<256x512xf32>, vector<2x512xf32> -> vector<2x512xf32>
    %36 = vector.extract_strided_slice %35 {offsets = [0, 0], sizes = [2, 32], strides = [1, 1]} : vector<2x512xf32> to vector<2x32xf32>
    %37 = vector.extract_strided_slice %35 {offsets = [0, 32], sizes = [2, 32], strides = [1, 1]} : vector<2x512xf32> to vector<2x32xf32>
    %38 = vector.extract_strided_slice %35 {offsets = [0, 64], sizes = [2, 32], strides = [1, 1]} : vector<2x512xf32> to vector<2x32xf32>
    %39 = vector.extract_strided_slice %35 {offsets = [0, 96], sizes = [2, 32], strides = [1, 1]} : vector<2x512xf32> to vector<2x32xf32>
    %40 = vector.extract_strided_slice %35 {offsets = [0, 128], sizes = [2, 32], strides = [1, 1]} : vector<2x512xf32> to vector<2x32xf32>
    %41 = vector.extract_strided_slice %35 {offsets = [0, 160], sizes = [2, 32], strides = [1, 1]} : vector<2x512xf32> to vector<2x32xf32>
    %42 = vector.extract_strided_slice %35 {offsets = [0, 192], sizes = [2, 32], strides = [1, 1]} : vector<2x512xf32> to vector<2x32xf32>
    %43 = vector.extract_strided_slice %35 {offsets = [0, 224], sizes = [2, 32], strides = [1, 1]} : vector<2x512xf32> to vector<2x32xf32>
    %44 = vector.extract_strided_slice %35 {offsets = [0, 256], sizes = [2, 32], strides = [1, 1]} : vector<2x512xf32> to vector<2x32xf32>
    %45 = vector.extract_strided_slice %35 {offsets = [0, 288], sizes = [2, 32], strides = [1, 1]} : vector<2x512xf32> to vector<2x32xf32>
    %46 = vector.extract_strided_slice %35 {offsets = [0, 320], sizes = [2, 32], strides = [1, 1]} : vector<2x512xf32> to vector<2x32xf32>
    %47 = vector.extract_strided_slice %35 {offsets = [0, 352], sizes = [2, 32], strides = [1, 1]} : vector<2x512xf32> to vector<2x32xf32>
    %48 = vector.extract_strided_slice %35 {offsets = [0, 384], sizes = [2, 32], strides = [1, 1]} : vector<2x512xf32> to vector<2x32xf32>
    %49 = vector.extract_strided_slice %35 {offsets = [0, 416], sizes = [2, 32], strides = [1, 1]} : vector<2x512xf32> to vector<2x32xf32>
    %50 = vector.extract_strided_slice %35 {offsets = [0, 448], sizes = [2, 32], strides = [1, 1]} : vector<2x512xf32> to vector<2x32xf32>
    %51 = vector.extract_strided_slice %35 {offsets = [0, 480], sizes = [2, 32], strides = [1, 1]} : vector<2x512xf32> to vector<2x32xf32>
    %52 = tpu.concatenate %36, %36, %37, %37, %38, %38, %39, %39, %40, %40, %41, %41, %42, %42, %43, %43 in 1 : vector<2x32xf32>, vector<2x32xf32>, vector<2x32xf32>, vector<2x32xf32>, vector<2x32xf32>, vector<2x32xf32>, vector<2x32xf32>, vector<2x32xf32>, vector<2x32xf32>, vector<2x32xf32>, vector<2x32xf32>, vector<2x32xf32>, vector<2x32xf32>, vector<2x32xf32>, vector<2x32xf32>, vector<2x32xf32> -> vector<2x512xf32>
    %53 = tpu.concatenate %44, %44, %45, %45, %46, %46, %47, %47, %48, %48, %49, %49, %50, %50, %51, %51 in 1 : vector<2x32xf32>, vector<2x32xf32>, vector<2x32xf32>, vector<2x32xf32>, vector<2x32xf32>, vector<2x32xf32>, vector<2x32xf32>, vector<2x32xf32>, vector<2x32xf32>, vector<2x32xf32>, vector<2x32xf32>, vector<2x32xf32>, vector<2x32xf32>, vector<2x32xf32>, vector<2x32xf32>, vector<2x32xf32> -> vector<2x512xf32>
    %54 = tpu.concatenate %52, %53 in 1 : vector<2x512xf32>, vector<2x512xf32> -> vector<2x1024xf32>
    %c0_14 = arith.constant 0 : index
    %c2 = arith.constant 2 : index
    %c0_15 = arith.constant 0 : index
    %55 = vector.load %arg7[%c0_14, %c2, %c0_15] : memref<1x4x1024xf32, #tpu.memory_space<vmem>>, vector<1x2x1024xf32>
    %56 = vector.shape_cast %55 : vector<1x2x1024xf32> to vector<2x1024xf32>
    %57 = vector.shape_cast %54 : vector<2x1024xf32> to vector<1x2x1024xf32>
    tpu.vector_store %arg7[%c0_14, %c2, %c0_15], %57 {strides = array<i32>} : memref<1x4x1024xf32, #tpu.memory_space<vmem>>, vector<1x2x1024xf32>,
    return
  }
  func.func @transform_0(%arg0: i32, %arg1: i32) -> (i32, i32, i32) {
    %c0_i32 = arith.constant 0 : i32
    %c0_i32_0 = arith.constant 0 : i32
    return %arg0, %c0_i32, %arg1 : i32, i32, i32
  }
  func.func @transform_1(%arg0: i32, %arg1: i32) -> (i32, i32, i32) {
    %c0_i32 = arith.constant 0 : i32
    %c0_i32_0 = arith.constant 0 : i32
    return %arg0, %c0_i32, %arg1 : i32, i32, i32
  }
  func.func @transform_2(%arg0: i32, %arg1: i32) -> (i32, i32) {
    %c0_i32 = arith.constant 0 : i32
    %c0_i32_0 = arith.constant 0 : i32
    %c0_i32_1 = arith.constant 0 : i32
    return %c0_i32, %c0_i32_0 : i32, i32
  }
  func.func @transform_3(%arg0: i32, %arg1: i32) -> (i32, i32) {
    %c0_i32 = arith.constant 0 : i32
    %c0_i32_0 = arith.constant 0 : i32
    %c0_i32_1 = arith.constant 0 : i32
    return %c0_i32, %c0_i32_0 : i32, i32
  }
  func.func @transform_4(%arg0: i32, %arg1: i32) -> (i32, i32) {
    %c0_i32 = arith.constant 0 : i32
    %c0_i32_0 = arith.constant 0 : i32
    %c0_i32_1 = arith.constant 0 : i32
    return %c0_i32, %c0_i32_0 : i32, i32
  }
  func.func @transform_5(%arg0: i32, %arg1: i32) -> (i32, i32, i32) {
    %c0_i32 = arith.constant 0 : i32
    %c0_i32_0 = arith.constant 0 : i32
    return %arg0, %c0_i32, %arg1 : i32, i32, i32
  }
}

</mosaic_0001>

<bundles_post_ra>
// kernel: up_sample_pallas.1
= control target key start
LH: loop header
LB: loop body
LE: loop exit
PB: predicated region body
PF: predicated region fallthrough
CT: control target
= control target key end

     0   :  { %s988_s18 = smov 0   ;;  %s990_s19 = smov 0   ;;  %s1478_s0 = inlined_call_operand.vmem [shape: f32[2,2,1024], index: 0, kind: input, shape index: {}]   ;;  %s1479_s1 = inlined_call_operand.vmem [shape: f32[2,4,256], index: 1, kind: input, shape index: {}]   ;;  %s1480_s2 = inlined_call_operand.vmem [shape: f32[2,4], index: 2, kind: input, shape index: {}]   ;;  %s1481_s3 = inlined_call_operand.vmem [shape: f32[2,1], index: 3, kind: input, shape index: {}]   ;;  %s1482_s4 = inlined_call_operand.vmem [shape: f32[256,512], index: 4, kind: input, shape index: {}]   ;;  %s1483_s5 = inlined_call_operand.vmem [shape: f32[2,4,1024], index: 5, kind: output, shape index: {}]  }
   0x1   :  { %s992_s20 = smov 0  }
   0x2 LB: > { %s27_s21 = sadd.s32 1, %s945_s19  ;;  %p878_p0 = scmp.ge.s32.totalorder %s949_s20, 1  ;;  %s949_s20 = sphi %s992_s20, %s15_s20   ;;  %s945_s19 = sphi %s990_s19, %s1485_s19   ;;  %s941_s18 = sphi %s988_s18, %s1484_s18  }
   0x3   : > { %p29_p1 = scmp.ge.s32.totalorder %s27_s21, 2  ;;  %p225_p2 = scmp.lt.s32.totalorder %s949_s20, 3 }
   0x5   : > { %s1487_s21 = smov (%p29_p1, %s27_s21), 0  ;;  %p226_p3 = pnand %p878_p0, %p225_p2 }
   0x6   : > { %p271_p4 = scmp.lt.s32.totalorder (!%p226_p3), %s941_s18, 1  ;;  %s955_s13 = smov (!%p226_p3), 96  }
   0x7   : > { %229 = sbr.rel (%p226_p3) target bundleno = 422 (0x1a6), region = 40  ;;  %s956_s14 = smov (!%p226_p3), 64  }
   0x8   : > { %s957_s15 = smov (!%p226_p3), 32  }
   0xc   : > { %v320_v0 = vld [vmem:[%s1480_s2] sm:$0x3]  ;;  %v951_v1 = vmov 0   ;;  %v952_v2 = vmov 2   ;;  %v446_v6 = vld [vmem:[%s1482_s4 + $0x1e8] sm:$0xff]  ;;  %v953_v18 = vmov 1  }
   0xd   : > { %921 = vset.pattern.permute.xlu0 %v951_v1  ;;  %923 = vset.pattern.permute.xlu1 %v952_v2  ;;  %v377_v3 = vld [vmem:[%s1481_s3] sm:$0x3]  ;;  %v510_v7 = vld [vmem:[%s1482_s4 + $0x3e8] sm:$0xff]  ;;  %v954_v19 = vmov 3   ;;  %s1489_s18 = smov (!%p271_p4, %s941_s18), 1  ;;  %vm693_vm0 = vcmask 261120  }
   0xe   : > { %v445_v4 = vld [vmem:[%s1482_s4 + $0x1e0] sm:$0xff]  ;;  %323 = vperm.xlu0 %921, %v320_v0   ;;  %350 = vperm.xlu1 %923, %v320_v0   ;;  %v442_v10 = vld [vmem:[%s1482_s4 + $0x1c8] sm:$0xff]  ;;  %s887_s23 = sshll.u32 %s1489_s18, 4  ;;  %s889_s16 = sshll.u32 %s1489_s18, 5  ;;  %vm695_vm1 = vcmask 523264   ;;  %vm697_vm2 = vcmask 785408  }
   0xf   : > { %v509_v5 = vld [vmem:[%s1482_s4 + $0x3e0] sm:$0xff]  ;;  %925 = vset.pattern.permute.xlu2 %v951_v1  ;;  %513 = vmatpush.msra.mxu0 %v445_v4  ;;  %v506_v11 = vld [vmem:[%s1482_s4 + $0x3c8] sm:$0xff]  ;;  %s278_s26 = scalar_lea.vmem %s1478_s0, %s887_s23  ;;  %s1427_s23 = scalar_lea.vmem %s1483_s5, %s889_s16  ;;  %vm752_vm3 = vcmask 1043456  }
  0x10   : > { %v441_v8 = vld [vmem:[%s1482_s4 + $0x1c0] sm:$0xff]  ;;  %380 = vperm.xlu2 %925, %v377_v3   ;;  %533 = vmatpush.msra.mxu1 %v509_v5  ;;  %v438_v14 = vld [vmem:[%s1482_s4 + $0x1a8] sm:$0xff] }
  0x11   : > { %v505_v9 = vld [vmem:[%s1482_s4 + $0x3c0] sm:$0xff]  ;;  %553 = vmatpush.msra.mxu2 %v446_v6  ;;  %573 = vmatpush.msra.mxu3 %v510_v7  ;;  %v502_v15 = vld [vmem:[%s1482_s4 + $0x3a8] sm:$0xff]  ;;  %v447_v7 = vld [vmem:[%s1482_s4 + $0x1f0] sm:$0xff] }
  0x12   : > { %v437_v12 = vld [vmem:[%s1482_s4 + $0x1a0] sm:$0xff]  ;;  %514 = vmatpush.msra.mxu0 %v441_v8  ;;  %534 = vmatpush.msra.mxu1 %v505_v9  ;;  %v434_v20 = vld [vmem:[%s1482_s4 + $0x188] sm:$0xff]  ;;  %v511_v8 = vld [vmem:[%s1482_s4 + $0x3f0] sm:$0xff] }
  0x13   : > { %v501_v13 = vld [vmem:[%s1482_s4 + $0x3a0] sm:$0xff]  ;;  %554 = vmatpush.msra.mxu2 %v442_v10  ;;  %574 = vmatpush.msra.mxu3 %v506_v11  ;;  %v498_v21 = vld [vmem:[%s1482_s4 + $0x388] sm:$0xff]  ;;  %v448_v9 = vld [vmem:[%s1482_s4 + $0x1f8] sm:$0xff] }
  0x14   : > { %515 = vmatpush.msra.mxu0 %v437_v12  ;;  %535 = vmatpush.msra.mxu1 %v501_v13  ;;  %v433_v16 = vld [vmem:[%s1482_s4 + $0x180] sm:$0xff]  ;;  %v430_v24 = vld [vmem:[%s1482_s4 + $0x168] sm:$0xff]  ;;  %v512_v10 = vld [vmem:[%s1482_s4 + $0x3f8] sm:$0xff] }
  0x15   : > { %555 = vmatpush.msra.mxu2 %v438_v14  ;;  %575 = vmatpush.msra.mxu3 %v502_v15  ;;  %v497_v17 = vld [vmem:[%s1482_s4 + $0x380] sm:$0xff]  ;;  %v494_v25 = vld [vmem:[%s1482_s4 + $0x368] sm:$0xff]  ;;  %v443_v11 = vld [vmem:[%s1482_s4 + $0x1d0] sm:$0xff] }
  0x16   : > { %922 = vset.pattern.permute.xlu0 %v953_v18  ;;  %924 = vset.pattern.permute.xlu1 %v954_v19  ;;  %v429_v22 = vld [vmem:[%s1482_s4 + $0x160] sm:$0xff]  ;;  %v426_v28 = vld [vmem:[%s1482_s4 + $0x148] sm:$0xff]  ;;  %v507_v12 = vld [vmem:[%s1482_s4 + $0x3d0] sm:$0xff] }
  0x17   : > { %336 = vperm.xlu0 %922, %v320_v0   ;;  %364 = vperm.xlu1 %924, %v320_v0   ;;  %v493_v23 = vld [vmem:[%s1482_s4 + $0x360] sm:$0xff]  ;;  %v490_v29 = vld [vmem:[%s1482_s4 + $0x348] sm:$0xff]  ;;  %v444_v13 = vld [vmem:[%s1482_s4 + $0x1d8] sm:$0xff] }
  0x18   : > { %516 = vmatpush.msra.mxu0 %v433_v16  ;;  %536 = vmatpush.msra.mxu1 %v497_v17  ;;  %v425_v26 = vld [vmem:[%s1482_s4 + $0x140] sm:$0xff]  ;;  %v422_v32 = vld [vmem:[%s1482_s4 + $0x128] sm:$0xff]  ;;  %v508_v14 = vld [vmem:[%s1482_s4 + $0x3d8] sm:$0xff] }
  0x19   : > { %556 = vmatpush.msra.mxu2 %v434_v20  ;;  %576 = vmatpush.msra.mxu3 %v498_v21  ;;  %v489_v27 = vld [vmem:[%s1482_s4 + $0x340] sm:$0xff]  ;;  %v486_v33 = vld [vmem:[%s1482_s4 + $0x328] sm:$0xff]  ;;  %v439_v17 = vld [vmem:[%s1482_s4 + $0x1b0] sm:$0xff] }
  0x1a   : > { %517 = vmatpush.msra.mxu0 %v429_v22  ;;  %537 = vmatpush.msra.mxu1 %v493_v23  ;;  %v421_v30 = vld [vmem:[%s1482_s4 + $0x120] sm:$0xff]  ;;  %v418_v36 = vld [vmem:[%s1482_s4 + $0x108] sm:$0xff]  ;;  %v440_v18 = vld [vmem:[%s1482_s4 + $0x1b8] sm:$0xff] }
  0x1b   : > { %557 = vmatpush.msra.mxu2 %v430_v24  ;;  %577 = vmatpush.msra.mxu3 %v494_v25  ;;  %v485_v31 = vld [vmem:[%s1482_s4 + $0x320] sm:$0xff]  ;;  %v482_v37 = vld [vmem:[%s1482_s4 + $0x308] sm:$0xff]  ;;  %v504_v19 = vld [vmem:[%s1482_s4 + $0x3b8] sm:$0xff] }
  0x1c   : > { %518 = vmatpush.msra.mxu0 %v425_v26  ;;  %538 = vmatpush.msra.mxu1 %v489_v27  ;;  %v417_v34 = vld [vmem:[%s1482_s4 + $0x100] sm:$0xff]  ;;  %v414_v40 = vld [vmem:[%s1482_s4 + $0xe8] sm:$0xff]  ;;  %v435_v20 = vld [vmem:[%s1482_s4 + $0x190] sm:$0xff] }
  0x1d   : > { %558 = vmatpush.msra.mxu2 %v426_v28  ;;  %578 = vmatpush.msra.mxu3 %v490_v29  ;;  %v481_v35 = vld [vmem:[%s1482_s4 + $0x300] sm:$0xff]  ;;  %v478_v41 = vld [vmem:[%s1482_s4 + $0x2e8] sm:$0xff]  ;;  %v499_v21 = vld [vmem:[%s1482_s4 + $0x390] sm:$0xff] }
  0x1e   : > { %519 = vmatpush.msra.mxu0 %v421_v30  ;;  %539 = vmatpush.msra.mxu1 %v485_v31  ;;  %v413_v38 = vld [vmem:[%s1482_s4 + $0xe0] sm:$0xff]  ;;  %v410_v44 = vld [vmem:[%s1482_s4 + $0xc8] sm:$0xff]  ;;  %v436_v22 = vld [vmem:[%s1482_s4 + $0x198] sm:$0xff] }
  0x1f   : > { %559 = vmatpush.msra.mxu2 %v422_v32  ;;  %579 = vmatpush.msra.mxu3 %v486_v33  ;;  %v477_v39 = vld [vmem:[%s1482_s4 + $0x2e0] sm:$0xff]  ;;  %v474_v45 = vld [vmem:[%s1482_s4 + $0x2c8] sm:$0xff]  ;;  %v500_v23 = vld [vmem:[%s1482_s4 + $0x398] sm:$0xff] }
  0x20   : > { %520 = vmatpush.msra.mxu0 %v417_v34  ;;  %540 = vmatpush.msra.mxu1 %v481_v35  ;;  %v409_v42 = vld [vmem:[%s1482_s4 + $0xc0] sm:$0xff]  ;;  %v406_v48 = vld [vmem:[%s1482_s4 + $0xa8] sm:$0xff]  ;;  %v431_v24 = vld [vmem:[%s1482_s4 + $0x170] sm:$0xff] }
  0x21   : > { %560 = vmatpush.msra.mxu2 %v418_v36  ;;  %580 = vmatpush.msra.mxu3 %v482_v37  ;;  %v473_v43 = vld [vmem:[%s1482_s4 + $0x2c0] sm:$0xff]  ;;  %v470_v49 = vld [vmem:[%s1482_s4 + $0x2a8] sm:$0xff]  ;;  %v495_v25 = vld [vmem:[%s1482_s4 + $0x370] sm:$0xff] }
  0x22   : > { %521 = vmatpush.msra.mxu0 %v413_v38  ;;  %541 = vmatpush.msra.mxu1 %v477_v39  ;;  %v405_v46 = vld [vmem:[%s1482_s4 + $0xa0] sm:$0xff]  ;;  %v402_v52 = vld [vmem:[%s1482_s4 + $0x88] sm:$0xff]  ;;  %v432_v26 = vld [vmem:[%s1482_s4 + $0x178] sm:$0xff] }
  0x23   : > { %561 = vmatpush.msra.mxu2 %v414_v40  ;;  %581 = vmatpush.msra.mxu3 %v478_v41  ;;  %v469_v47 = vld [vmem:[%s1482_s4 + $0x2a0] sm:$0xff]  ;;  %v466_v53 = vld [vmem:[%s1482_s4 + $0x288] sm:$0xff]  ;;  %v496_v27 = vld [vmem:[%s1482_s4 + $0x378] sm:$0xff] }
  0x24   : > { %522 = vmatpush.msra.mxu0 %v409_v42  ;;  %542 = vmatpush.msra.mxu1 %v473_v43  ;;  %v401_v50 = vld [vmem:[%s1482_s4 + $0x80] sm:$0xff]  ;;  %v398_v56 = vld [vmem:[%s1482_s4 + $0x68] sm:$0xff]  ;;  %v427_v28 = vld [vmem:[%s1482_s4 + $0x150] sm:$0xff] }
  0x25   : > { %562 = vmatpush.msra.mxu2 %v410_v44  ;;  %582 = vmatpush.msra.mxu3 %v474_v45  ;;  %v465_v51 = vld [vmem:[%s1482_s4 + $0x280] sm:$0xff]  ;;  %v462_v57 = vld [vmem:[%s1482_s4 + $0x268] sm:$0xff]  ;;  %v491_v29 = vld [vmem:[%s1482_s4 + $0x350] sm:$0xff] }
  0x26   : > { %523 = vmatpush.msra.mxu0 %v405_v46  ;;  %543 = vmatpush.msra.mxu1 %v469_v47  ;;  %v397_v54 = vld [vmem:[%s1482_s4 + $0x60] sm:$0xff]  ;;  %v394_v60 = vld [vmem:[%s1482_s4 + $0x48] sm:$0xff]  ;;  %v428_v30 = vld [vmem:[%s1482_s4 + $0x158] sm:$0xff] }
  0x27   : > { %563 = vmatpush.msra.mxu2 %v406_v48  ;;  %583 = vmatpush.msra.mxu3 %v470_v49  ;;  %v461_v55 = vld [vmem:[%s1482_s4 + $0x260] sm:$0xff]  ;;  %v458_v61 = vld [vmem:[%s1482_s4 + $0x248] sm:$0xff]  ;;  %v492_v31 = vld [vmem:[%s1482_s4 + $0x358] sm:$0xff] }
  0x28   : > { %524 = vmatpush.msra.mxu0 %v401_v50  ;;  %544 = vmatpush.msra.mxu1 %v465_v51  ;;  %v393_v58 = vld [vmem:[%s1482_s4 + $0x40] sm:$0xff]  ;;  %v390_v0 = vld [vmem:[%s1482_s4 + $0x28] sm:$0xff]  ;;  %v423_v32 = vld [vmem:[%s1482_s4 + $0x130] sm:$0xff] }
  0x29   : > { %564 = vmatpush.msra.mxu2 %v402_v52  ;;  %584 = vmatpush.msra.mxu3 %v466_v53  ;;  %v457_v59 = vld [vmem:[%s1482_s4 + $0x240] sm:$0xff]  ;;  %v454_v2 = vld [vmem:[%s1482_s4 + $0x228] sm:$0xff]  ;;  %v487_v33 = vld [vmem:[%s1482_s4 + $0x330] sm:$0xff] }
  0x2a   : > { %525 = vmatpush.msra.mxu0 %v397_v54  ;;  %545 = vmatpush.msra.mxu1 %v461_v55  ;;  %v389_v62 = vld [vmem:[%s1482_s4 + $0x20] sm:$0xff]  ;;  %v386_v5 = vld [vmem:[%s1482_s4 + $0x8] sm:$0xff]  ;;  %v424_v34 = vld [vmem:[%s1482_s4 + $0x138] sm:$0xff] }
  0x2b   : > { %565 = vmatpush.msra.mxu2 %v398_v56  ;;  %585 = vmatpush.msra.mxu3 %v462_v57  ;;  %v453_v63 = vld [vmem:[%s1482_s4 + $0x220] sm:$0xff]  ;;  %v450_v6 = vld [vmem:[%s1482_s4 + $0x208] sm:$0xff]  ;;  %v488_v35 = vld [vmem:[%s1482_s4 + $0x338] sm:$0xff] }
  0x2c   : > { %526 = vmatpush.msra.mxu0 %v393_v58  ;;  %546 = vmatpush.msra.mxu1 %v457_v59  ;;  %v385_v3 = vld [vmem:[%s1482_s4] sm:$0xff]  ;;  %v301_v16 = vld [vmem:[%s278_s26 + $0x8] sm:$0xff]  ;;  %v419_v36 = vld [vmem:[%s1482_s4 + $0x110] sm:$0xff] }
  0x2d   : > { %566 = vmatpush.msra.mxu2 %v394_v60  ;;  %586 = vmatpush.msra.mxu3 %v458_v61  ;;  %v449_v4 = vld [vmem:[%s1482_s4 + $0x200] sm:$0xff]  ;;  %306 = vst [vmem:[#allocation1 + $0x10] ss:$2 sm:$0xff] %v301_v16  ;;  %v483_v37 = vld [vmem:[%s1482_s4 + $0x310] sm:$0xff]  ;;  %v420_v38 = vld [vmem:[%s1482_s4 + $0x118] sm:$0xff] }
  0x2e   : > { %527 = vmatpush.msra.mxu0 %v389_v62  ;;  %547 = vmatpush.msra.mxu1 %v453_v63  ;;  %v300_v15 = vld [vmem:[%s278_s26] sm:$0xff]  ;;  %v484_v39 = vld [vmem:[%s1482_s4 + $0x318] sm:$0xff]  ;;  %v415_v40 = vld [vmem:[%s1482_s4 + $0xf0] sm:$0xff]  ;;  %s888_s26 = sshll.u32 %s1489_s18, 3 }
  0x2f   : > { %567 = vmatpush.msra.mxu2 %v390_v0  ;;  %587 = vmatpush.msra.mxu3 %v454_v2  ;;  %304 = vst [vmem:[#allocation1] ss:$2 sm:$0xff] %v300_v15  ;;  %v479_v41 = vld [vmem:[%s1482_s4 + $0x2f0] sm:$0xff]  ;;  %v416_v42 = vld [vmem:[%s1482_s4 + $0xf8] sm:$0xff]  ;;  %s288_s12 = scalar_lea.vmem %s1479_s1, %s888_s26 }
  0x30   : > { %528 = vmatpush.msra.mxu0 %v385_v3  ;;  %548 = vmatpush.msra.mxu1 %v449_v4  ;;  %v480_v43 = vld [vmem:[%s1482_s4 + $0x2f8] sm:$0xff]  ;;  %v411_v44 = vld [vmem:[%s1482_s4 + $0xd0] sm:$0xff] }
  0x31   : > { %568 = vmatpush.msra.mxu2 %v386_v5  ;;  %588 = vmatpush.msra.mxu3 %v450_v6  ;;  %v475_v45 = vld [vmem:[%s1482_s4 + $0x2d0] sm:$0xff]  ;;  %v412_v46 = vld [vmem:[%s1482_s4 + $0xd8] sm:$0xff] }
  0x32   : > { %593 = vmatpush.msrb.mxu0 %v447_v7  ;;  %613 = vmatpush.msrb.mxu1 %v511_v8  ;;  %v476_v47 = vld [vmem:[%s1482_s4 + $0x2d8] sm:$0xff]  ;;  %v407_v48 = vld [vmem:[%s1482_s4 + $0xb0] sm:$0xff] }
  0x33   : > { %633 = vmatpush.msrb.mxu2 %v448_v9  ;;  %653 = vmatpush.msrb.mxu3 %v512_v10  ;;  %v471_v49 = vld [vmem:[%s1482_s4 + $0x2b0] sm:$0xff]  ;;  %v408_v50 = vld [vmem:[%s1482_s4 + $0xb8] sm:$0xff]  ;;  %v319_v9 = vld [vmem:[%s288_s12] sm:$0xff] }
  0x34   : > { %594 = vmatpush.msrb.mxu0 %v443_v11  ;;  %614 = vmatpush.msrb.mxu1 %v507_v12  ;;  %v472_v51 = vld [vmem:[%s1482_s4 + $0x2b8] sm:$0xff]  ;;  %v403_v52 = vld [vmem:[%s1482_s4 + $0x90] sm:$0xff]  ;;  %v327_v12 = vperm.slane %v319_v9, 0  ;;  %v340_v15 = vperm.slane %v319_v9, 5  ;;  %v353_v16 = vperm.slane %v319_v9, 2 }
  0x35   : > { %634 = vmatpush.msrb.mxu2 %v444_v13  ;;  %654 = vmatpush.msrb.mxu3 %v508_v14  ;;  %v467_v53 = vld [vmem:[%s1482_s4 + $0x290] sm:$0xff]  ;;  %v404_v54 = vld [vmem:[%s1482_s4 + $0x98] sm:$0xff]  ;;  %v328_v13 = vperm.slane %v319_v9, 4  ;;  %v339_v14 = vperm.slane %v319_v9, 1 }
  0x36   : > { %926 = vset.pattern.permute.xlu0 %v951_v1  ;;  %595 = vmatpush.msrb.mxu0 %v439_v17  ;;  %v503_v1 = vld [vmem:[%s1482_s4 + $0x3b0] sm:$0xff]  ;;  %v468_v55 = vld [vmem:[%s1482_s4 + $0x298] sm:$0xff]  ;;  %v354_v17 = vperm.slane %v319_v9, 6 }
  0x37   : > { %615 = vmatpush.msrb.mxu1 %v503_v1  ;;  %635 = vmatpush.msrb.mxu2 %v440_v18  ;;  %v399_v56 = vld [vmem:[%s1482_s4 + $0x70] sm:$0xff]  ;;  %v400_v58 = vld [vmem:[%s1482_s4 + $0x78] sm:$0xff]  ;;  %v367_v1 = vperm.slane %v319_v9, 3  ;;  %v368_v18 = vperm.slane %v319_v9, 7 }
  0x38   : > { %655 = vmatpush.msrb.mxu3 %v504_v19  ;;  %596 = vmatpush.msrb.mxu0 %v435_v20  ;;  %v463_v57 = vld [vmem:[%s1482_s4 + $0x270] sm:$0xff]  ;;  %v464_v59 = vld [vmem:[%s1482_s4 + $0x278] sm:$0xff]  ;;  %v331_v19 = vperm.slane %v327_v12, 0  ;;  %v332_v20 = vperm.slane %v328_v13, 0 }
  0x39   : > { %616 = vmatpush.msrb.mxu1 %v499_v21  ;;  %636 = vmatpush.msrb.mxu2 %v436_v22  ;;  %v395_v60 = vld [vmem:[%s1482_s4 + $0x50] sm:$0xff]  ;;  %v396_v62 = vld [vmem:[%s1482_s4 + $0x58] sm:$0xff]  ;;  %v343_v21 = vperm.slane %v339_v14, 1  ;;  %v344_v22 = vperm.slane %v340_v15, 1 }
  0x3a   : > { %656 = vmatpush.msrb.mxu3 %v500_v23  ;;  %597 = vmatpush.msrb.mxu0 %v431_v24  ;;  %v459_v61 = vld [vmem:[%s1482_s4 + $0x250] sm:$0xff]  ;;  %v460_v63 = vld [vmem:[%s1482_s4 + $0x258] sm:$0xff]  ;;  %v357_v23 = vperm.slane %v353_v16, 2  ;;  %v358_v24 = vperm.slane %v354_v17, 2 }
  0x3b   : > { %617 = vmatpush.msrb.mxu1 %v495_v25  ;;  %637 = vmatpush.msrb.mxu2 %v432_v26  ;;  %v391_v0 = vld [vmem:[%s1482_s4 + $0x30] sm:$0xff]  ;;  %v392_v3 = vld [vmem:[%s1482_s4 + $0x38] sm:$0xff]  ;;  %v371_v25 = vperm.slane %v367_v1, 3  ;;  %v372_v26 = vperm.slane %v368_v18, 3 }
  0x3c   : > { %657 = vmatpush.msrb.mxu3 %v496_v27  ;;  %598 = vmatpush.msrb.mxu0 %v427_v28  ;;  %v455_v2 = vld [vmem:[%s1482_s4 + $0x230] sm:$0xff]  ;;  %v456_v4 = vld [vmem:[%s1482_s4 + $0x238] sm:$0xff] }
  0x3d   : > { %618 = vmatpush.msrb.mxu1 %v491_v29  ;;  %638 = vmatpush.msrb.mxu2 %v428_v30  ;;  %v387_v5 = vld [vmem:[%s1482_s4 + $0x10] sm:$0xff]  ;;  %v388_v7 = vld [vmem:[%s1482_s4 + $0x18] sm:$0xff] }
  0x3e   : > { %658 = vmatpush.msrb.mxu3 %v492_v31  ;;  %599 = vmatpush.msrb.mxu0 %v423_v32  ;;  %v451_v6 = vld [vmem:[%s1482_s4 + $0x210] sm:$0xff]  ;;  %v452_v8 = vld [vmem:[%s1482_s4 + $0x218] sm:$0xff] }
  0x3f   : > { %619 = vmatpush.msrb.mxu1 %v487_v33  ;;  %639 = vmatpush.msrb.mxu2 %v424_v34 }
  0x40   : > { %659 = vmatpush.msrb.mxu3 %v488_v35  ;;  %600 = vmatpush.msrb.mxu0 %v419_v36 }
  0x41   : > { %620 = vmatpush.msrb.mxu1 %v483_v37  ;;  %640 = vmatpush.msrb.mxu2 %v420_v38 }
  0x42   : > { %660 = vmatpush.msrb.mxu3 %v484_v39  ;;  %601 = vmatpush.msrb.mxu0 %v415_v40 }
  0x43   : > { %621 = vmatpush.msrb.mxu1 %v479_v41  ;;  %641 = vmatpush.msrb.mxu2 %v416_v42 }
  0x44   : > { %661 = vmatpush.msrb.mxu3 %v480_v43  ;;  %602 = vmatpush.msrb.mxu0 %v411_v44 }
  0x45   : > { %622 = vmatpush.msrb.mxu1 %v475_v45  ;;  %642 = vmatpush.msrb.mxu2 %v412_v46 }
  0x46   : > { %662 = vmatpush.msrb.mxu3 %v476_v47  ;;  %603 = vmatpush.msrb.mxu0 %v407_v48 }
  0x47   : > { %623 = vmatpush.msrb.mxu1 %v471_v49  ;;  %643 = vmatpush.msrb.mxu2 %v408_v50 }
  0x48   : > { %663 = vmatpush.msrb.mxu3 %v472_v51  ;;  %604 = vmatpush.msrb.mxu0 %v403_v52 }
  0x49   : > { %624 = vmatpush.msrb.mxu1 %v467_v53  ;;  %644 = vmatpush.msrb.mxu2 %v404_v54 }
  0x4a   : > { %664 = vmatpush.msrb.mxu3 %v468_v55  ;;  %605 = vmatpush.msrb.mxu0 %v399_v56 }
  0x4b   : > { %625 = vmatpush.msrb.mxu1 %v463_v57  ;;  %645 = vmatpush.msrb.mxu2 %v400_v58  ;;  %v307_v58 = vld.sshfl [vmem:[#allocation1] sm:$0xff pattern:$0x75643120] }
  0x4c   : > { %665 = vmatpush.msrb.mxu3 %v464_v59  ;;  %606 = vmatpush.msrb.mxu0 %v395_v60  ;;  %v308_v59 = vld.sshfl [vmem:[#allocation1 + $0x8] sm:$0xff pattern:$0x75643120]  ;;  %v309_v60 = vld.sshfl [vmem:[#allocation1 + $0x10] sm:$0xff pattern:$0x75643120] }
  0x4d   : > { %626 = vmatpush.msrb.mxu1 %v459_v61  ;;  %646 = vmatpush.msrb.mxu2 %v396_v62  ;;  %v310_v61 = vld.sshfl [vmem:[#allocation1 + $0x18] sm:$0xff pattern:$0x75643120]  ;;  %315 = vst [vmem:[%s1427_s23] sm:$0x33] %v307_v58 }
  0x4e   : > { %666 = vmatpush.msrb.mxu3 %v460_v63  ;;  %607 = vmatpush.msrb.mxu0 %v391_v0  ;;  %316 = vst [vmem:[%s1427_s23 + $0x8] sm:$0x33] %v308_v59 }
  0x4f   : > { %627 = vmatpush.msrb.mxu1 %v455_v2  ;;  %647 = vmatpush.msrb.mxu2 %v392_v3  ;;  %317 = vst [vmem:[%s1427_s23 + $0x10] sm:$0x33] %v309_v60 }
  0x50   : > { %667 = vmatpush.msrb.mxu3 %v456_v4  ;;  %608 = vmatpush.msrb.mxu0 %v387_v5  ;;  %318 = vst [vmem:[%s1427_s23 + $0x18] sm:$0x33] %v310_v61 }
  0x51   : > { %628 = vmatpush.msrb.mxu1 %v451_v6  ;;  %648 = vmatpush.msrb.mxu2 %v388_v7 }
  0x52   : > { %668 = vmatpush.msrb.mxu3 %v452_v8 }
  0x6a   : > { %v381_v41 = vpop.permute.xlu2 %380 }
  0x80   : > { %v324_v10 = vpop.permute.xlu0 %323  ;;  %v351_v11 = vpop.permute.xlu1 %350 }
  0x81   : > { %v333_v29 = vmul.f32 %v331_v19, %v324_v10  ;;  %v334_v30 = vmul.f32 %v332_v20, %v324_v10  ;;  %v359_v33 = vmul.f32 %v357_v23, %v351_v11  ;;  %v360_v34 = vmul.f32 %v358_v24, %v351_v11 }
  0x89   : > { %v337_v27 = vpop.permute.xlu0 %336  ;;  %v365_v28 = vpop.permute.xlu1 %364 }
  0x8a   : > { %v345_v31 = vmul.f32 %v343_v21, %v337_v27  ;;  %v346_v32 = vmul.f32 %v344_v22, %v337_v27  ;;  %v373_v37 = vmul.f32 %v371_v25, %v365_v28  ;;  %v374_v38 = vmul.f32 %v372_v26, %v365_v28 }
  0x8c   : > { %v347_v35 = vadd.f32 %v345_v31, %v333_v29  ;;  %v348_v36 = vadd.f32 %v346_v32, %v334_v30 }
  0x8e   : > { %v361_v39 = vadd.f32 %v359_v33, %v347_v35  ;;  %v362_v40 = vadd.f32 %v360_v34, %v348_v36 }
  0x90   : > { %v375_v42 = vadd.f32 %v373_v37, %v361_v39  ;;  %v376_v43 = vadd.f32 %v374_v38, %v362_v40 }
  0x92   : > { %v383_v44 = vadd.f32 %v381_v41, %v375_v42  ;;  %v384_v45 = vadd.f32 %v381_v41, %v376_v43 }
  0x94   : > { %529 = vmatmul.f32.vlgmr.msra.gmra.mxu0 %v383_v44  ;;  %549 = vmatmul.f32.vlgmr.msra.gmra.mxu1 %v384_v45 }
  0x95   : > { %569 = vmatmul.f32.vlgmr.msra.gmra.mxu2 %v383_v44  ;;  %589 = vmatmul.f32.vlgmr.msra.gmra.mxu3 %v384_v45 }
  0x9c   : > { %609 = vmatmul.f32.vlgmr.msrb.gmra.mxu0 %v383_v44  ;;  %629 = vmatmul.f32.vlgmr.msrb.gmra.mxu1 %v384_v45 }
  0x9d   : > { %649 = vmatmul.f32.vlgmr.msrb.gmra.mxu2 %v383_v44  ;;  %669 = vmatmul.f32.vlgmr.msrb.gmra.mxu3 %v384_v45 }
 0x111   : > { %v530_v46 = vpop.f32.mrf.mxu0  ;;  %v550_v47 = vpop.f32.mrf.mxu1 }
 0x112   : > { %v551_v48 = vadd.f32 %v550_v47, %v530_v46 }
 0x114   : > { %680 = vrot.lane.b32.xlu1 %v551_v48, %s955_s13  ;;  %677 = vrot.lane.b32.xlu2 %v551_v48, %s956_s14 }
 0x118   : > { %v570_v49 = vpop.f32.mrf.mxu2  ;;  %v590_v50 = vpop.f32.mrf.mxu3 }
 0x119   : > { %v1413_v51 = vadd.f32 %v590_v50, %v570_v49  ;;  %v610_v52 = vpop.f32.mrf.mxu0  ;;  %v630_v53 = vpop.f32.mrf.mxu1 }
 0x11a   : > { %v1415_v54 = vadd.f32 %v630_v53, %v610_v52 }
 0x11b   : > { %690 = vrot.lane.b32.xlu0 %v1413_v51, %s955_s13 }
 0x11c   : > { %712 = vrot.lane.b32.xlu1 %v1415_v54, %s956_s14  ;;  %674 = vrot.lane.b32.xlu2 %v551_v48, %s957_s15 }
 0x120   : > { %v650_v55 = vpop.f32.mrf.mxu2  ;;  %v670_v56 = vpop.f32.mrf.mxu3 }
 0x121   : > { %v671_v57 = vadd.f32 %v670_v56, %v650_v55 }
 0x123   : > { %722 = vrot.lane.b32.xlu0 %v671_v57, %s956_s14 }
 0x124   : > { %725 = vrot.lane.b32.xlu1 %v671_v57, %s955_s13  ;;  %687 = vrot.lane.b32.xlu2 %v1413_v51, %s956_s14 }
 0x12b   : > { %684 = vrot.lane.b32.xlu0 %v1413_v51, %s957_s15 }
 0x12c   : > { %709 = vrot.lane.b32.xlu1 %v1415_v54, %s957_s15  ;;  %715 = vrot.lane.b32.xlu2 %v1415_v54, %s955_s13 }
 0x134   : > { %719 = vrot.lane.b32.xlu2 %v671_v57, %s957_s15 }
 0x16e   : > { %v678_v62 = vpop.permute.xlu2 %677 }
 0x176   : > { %v675_v63 = vpop.permute.xlu2 %674 }
 0x177   : > { %v694_v2 = vsel %vm693_vm0, %v551_v48, %v675_v63 }
 0x178   : > { %v696_v5 = vsel %vm695_vm1, %v694_v2, %v675_v63 }
 0x179   : > { %v698_v10 = vsel %vm697_vm2, %v696_v5, %v678_v62 }
 0x17e   : > { %v688_v0 = vpop.permute.xlu2 %687 }
 0x186   : > { %v681_v3 = vpop.permute.xlu1 %680  ;;  %v716_v9 = vpop.permute.xlu2 %715 }
 0x187   : > { %v699_v4 = vsel %vm693_vm0, %v678_v62, %v681_v3 }
 0x188   : > { %v700_v6 = vsel %vm695_vm1, %v699_v4, %v681_v3 }
 0x189   : > { %v701_v7 = vsel %vm697_vm2, %v700_v6, %v551_v48 }
 0x18a   : > { %v748_v8 = vrot.slane %v701_v7, 4 }
 0x18c   : > { %v753_v11 = vsel %vm752_vm3, %v698_v10, %v748_v8 }
 0x18d   : > { %v757_v12 = vrot.slane %v753_v11, 6  ;;  %v691_v13 = vpop.permute.xlu0 %690 }
 0x18e   : > { %v713_v14 = vpop.permute.xlu1 %712  ;;  %v720_v15 = vpop.permute.xlu2 %719  ;;  %v705_v17 = vsel %vm693_vm0, %v688_v0, %v691_v13 }
 0x18f   : > { %765 = vst [vmem:[%s1427_s23] sm:$0xcc] %v757_v12  ;;  %v731_v18 = vsel %vm693_vm0, %v713_v14, %v716_v9  ;;  %v734_v19 = vsel %vm693_vm0, %v671_v57, %v720_v15  ;;  %v706_v22 = vsel %vm695_vm1, %v705_v17, %v691_v13 }
 0x190   : > { %v732_v24 = vsel %vm695_vm1, %v731_v18, %v716_v9  ;;  %v735_v25 = vsel %vm695_vm1, %v734_v19, %v720_v15  ;;  %v707_v28 = vsel %vm697_vm2, %v706_v22, %v1413_v51 }
 0x191   : > { %v733_v30 = vsel %vm697_vm2, %v732_v24, %v1415_v54  ;;  %v749_v35 = vrot.slane %v707_v28, 4 }
 0x192   : > { %v750_v38 = vrot.slane %v733_v30, 4 }
 0x195   : > { %v723_v16 = vpop.permute.xlu0 %722 }
 0x196   : > { %v726_v1 = vpop.permute.xlu1 %725  ;;  %v736_v27 = vsel %vm697_vm2, %v735_v25, %v723_v16 }
 0x197   : > { %v737_v20 = vsel %vm693_vm0, %v723_v16, %v726_v1 }
 0x198   : > { %v738_v21 = vsel %vm695_vm1, %v737_v20, %v726_v1 }
 0x199   : > { %v739_v23 = vsel %vm697_vm2, %v738_v21, %v671_v57 }
 0x19a   : > { %v751_v26 = vrot.slane %v739_v23, 4 }
 0x19c   : > { %v756_v29 = vsel %vm752_vm3, %v736_v27, %v751_v26 }
 0x19d   : > { %v760_v31 = vrot.slane %v756_v29, 6  ;;  %v685_v32 = vpop.permute.xlu0 %684 }
 0x19e   : > { %v702_v33 = vsel %vm693_vm0, %v1413_v51, %v685_v32  ;;  %v710_v34 = vpop.permute.xlu1 %709 }
 0x19f   : > { %768 = vst [vmem:[%s1427_s23 + $0x18] sm:$0xcc] %v760_v31  ;;  %v703_v36 = vsel %vm695_vm1, %v702_v33, %v685_v32  ;;  %v728_v37 = vsel %vm693_vm0, %v1415_v54, %v710_v34 }
 0x1a0   : > { %v704_v39 = vsel %vm697_vm2, %v703_v36, %v688_v0  ;;  %v729_v40 = vsel %vm695_vm1, %v728_v37, %v710_v34 }
 0x1a1   : > { %v754_v41 = vsel %vm752_vm3, %v704_v39, %v749_v35  ;;  %v730_v42 = vsel %vm697_vm2, %v729_v40, %v713_v14 }
 0x1a2   : > { %v758_v43 = vrot.slane %v754_v41, 6  ;;  %v755_v44 = vsel %vm752_vm3, %v730_v42, %v750_v38 }
 0x1a3   : > { %v759_v45 = vrot.slane %v755_v44, 6 }
 0x1a4   : > { %766 = vst [vmem:[%s1427_s23 + $0x8] sm:$0xcc] %v758_v43 }
 0x1a5   : > { %767 = vst [vmem:[%s1427_s23 + $0x10] sm:$0xcc] %v759_v45 }
 0x1a6 PF: > { %s15_s20 = sadd.s32 1, %s949_s20   ;;  %s1484_s18 = smov %s945_s19 }
 0x1a7   : > { %p12_p5 = scmp.ge.s32.totalorder %s15_s20, 4   ;;  %s1485_s19 = smov %s1487_s21 }
 0x1a9   :  { %14 = sbr.rel (!%p12_p5) target bundleno = 2 (0x2), region = 74 }

</bundles_post_ra>
